<compile_context>
chip_gen: v6e
topology: v6e:2x2x1
jax: 0.10.0
libtpu: 0.0.40
codegen_flags: <defaults>
</compile_context>

<pallas_src>
import jax
import jax.numpy as jnp
from jax.experimental import pallas as pl
from jax.experimental.pallas import tpu as pltpu

# ----- model dims (match the PyTorch module defaults) -----
IN_N = 4      # inputNeurons
MID_N = 3     # midNeurons
HID_N = 2     # hiddenNeurons
OUT_N = 4     # outputNeurons

PAD = 128     # lane width for all slabs
BATCH = 8     # small demo batch (multiple of 8 sublanes)
TB_MAX = 2048  # batch-tile rows; amortizes ~0.35us/step, well inside VMEM on v5e/v6e/v7x

# Shared lane layout (used by the input slab, the heads slab and the output slab):
#   lanes [0, 4)  : sigmoid(decoderOut)          (output slab only)
#   lanes [4, 6)  : mu                           (heads + output slab)
#   lanes [6, 8)  : logvar / eps / eps*std       (heads, input, output slab)
#   lanes [8, 12) : raw input x                  (input slab only)
MU_LO = OUT_N                # 4
LV_LO = OUT_N + HID_N        # 6
X_LO = OUT_N + 2 * HID_N     # 8


def _vae_kernel(xin_ref, w_ref, b_ref, out_ref):
    """4 dependent matmuls; weights packed as w_ref[(layer), 128, 128] in bf16."""
    xin = xin_ref[...]                                   # (TB, 128) f32
    b = b_ref[...]                                       # (8, 128)  f32
    lane = jax.lax.broadcasted_iota(jnp.int32, xin.shape, 1)
    mu_mask = (lane >= MU_LO) & (lane < MU_LO + HID_N)
    lv_mask = (lane >= LV_LO) & (lane < LV_LO + HID_N)

    def dense(a, layer):
        # bf16 MXU operands (weights stored bf16); accumulate + bias stay f32.
        return jnp.dot(a.astype(jnp.bfloat16), w_ref[layer],
                       preferred_element_type=jnp.float32) + b[layer:layer + 1, :]

    # encoder
    z1 = jnp.maximum(dense(xin, 0), 0.0)       # mid activations in lanes [0, MID_N)
    heads = dense(z1, 1)                       # mu in [4,6), logvar in [6,8), 0 elsewhere

    # reparameterize: z2 = eps * exp(0.5*logvar) + mu  (lane-aligned, no cross-lane moves)
    # heads are masked to the logvar lanes BEFORE exp -> no inf*0 NaN from large mu.
    std = jnp.exp(0.5 * jnp.where(lv_mask, heads, 0.0))
    eps = jnp.where(lv_mask, xin, 0.0)          # eps was placed in the logvar lanes
    z2 = jnp.where(mu_mask, heads, 0.0) + eps * std   # mu in [4,6), eps*std in [6,8)

    # decoder (decode weight duplicated over the mu-lane and eps*std-lane row groups,
    # so z2 @ Wd_pad == (mu + eps*std) @ Wd exactly)
    h = jnp.maximum(dense(z2, 2), 0.0)          # mid activations in lanes [0, MID_N)
    logits = dense(h, 3)                        # output logits in lanes [0, OUT_N)

    # exact sigmoid (EUP has slack; no approx reciprocal needed)
    sig = 1.0 / (1.0 + jnp.exp(-logits))

    # fused output slab: sigmoid out in [0,4), mu/logvar already live in [4,8);
    # masking the sigmoid keeps every padded lane exactly 0.
    out_ref[...] = jnp.where(lane < OUT_N, sig, 0.0) + heads


def prepare_params(p):
    """One-time packing: (4,128,128) bf16 weight slab + (8,128) f32 bias slab."""
    w = jnp.zeros((4, PAD, PAD), jnp.float32)
    # layer 0: fullyConnected, x lanes [8,12) -> mid lanes [0, MID_N)
    w = w.at[0, X_LO:X_LO + IN_N, :MID_N].set(p["fc_w"].T)
    # layer 1: fused encoderMean | encoderStDev, mid -> mu [4,6) | logvar [6,8)
    w = w.at[1, :MID_N, MU_LO:MU_LO + HID_N].set(p["mu_w"].T)
    w = w.at[1, :MID_N, LV_LO:LV_LO + HID_N].set(p["lv_w"].T)
    # layer 2: decodeFc, duplicated over mu-lane rows and eps*std-lane rows
    w = w.at[2, MU_LO:MU_LO + HID_N, :MID_N].set(p["dec_w"].T)
    w = w.at[2, LV_LO:LV_LO + HID_N, :MID_N].set(p["dec_w"].T)
    # layer 3: decoderOut, mid -> out lanes [0, OUT_N)
    w = w.at[3, :MID_N, :OUT_N].set(p["out_w"].T)

    b = jnp.zeros((8, PAD), jnp.float32)
    b = b.at[0, :MID_N].set(p["fc_b"])
    b = b.at[1, MU_LO:MU_LO + HID_N].set(p["mu_b"])
    b = b.at[1, LV_LO:LV_LO + HID_N].set(p["lv_b"])
    b = b.at[2, :MID_N].set(p["dec_b"])
    b = b.at[3, :OUT_N].set(p["out_b"])
    # bf16 weights halve the dominant per-call HBM transfer; biases stay f32.
    return w.astype(jnp.bfloat16), b


def _round_up(n, m):
    return (n + m - 1) // m * m


@jax.jit
def vae_forward(x, eps, w_pack, b_pack):
    """x: (B, IN_N) f32, eps: (B, HID_N) f32. Returns (out, mu, logvar)."""
    B = x.shape[0]
    # fixed batch tile + padded batch (no TB=B fallback -> no VMEM blowup at large ragged B)
    TB = TB_MAX if B >= TB_MAX else _round_up(B, 8)
    B_pad = _round_up(B, TB)

    # single fused activation slab: eps in the logvar lanes, x in lanes [8,12)
    xin = jnp.zeros((B_pad, PAD), jnp.float32)
    xin = xin.at[:B, LV_LO:LV_LO + HID_N].set(eps)
    xin = xin.at[:B, X_LO:X_LO + IN_N].set(x)

    out_slab = pl.pallas_call(
        _vae_kernel,
        grid=(B_pad // TB,),
        in_specs=[pl.BlockSpec((TB, PAD), lambda i: (i, 0)),
                  pl.BlockSpec((4, PAD, PAD), lambda i: (0, 0, 0)),
                  pl.BlockSpec((8, PAD), lambda i: (0, 0))],
        out_specs=pl.BlockSpec((TB, PAD), lambda i: (i, 0)),
        out_shape=jax.ShapeDtypeStruct((B_pad, PAD), jnp.float32),
        compiler_params=pltpu.CompilerParams(dimension_semantics=("parallel",)),
    )(xin, w_pack, b_pack)

    # one fused slab -> three cheap slices (and drop batch padding)
    out = out_slab[:B, :OUT_N]
    mu = out_slab[:B, MU_LO:MU_LO + HID_N]
    logvar = out_slab[:B, LV_LO:LV_LO + HID_N]
    return out, mu, logvar


def init_params(key):
    """Deterministic synthetic params, same shapes/init style as the PyTorch module."""
    ks = jax.random.split(key, 10)

    def lin(kw, kb, fan_in, fan_out):
        bound = 1.0 / jnp.sqrt(fan_in)
        w = jax.random.uniform(kw, (fan_out, fan_in), jnp.float32, -bound, bound)
        b = jax.random.uniform(kb, (fan_out,), jnp.float32, -bound, bound)
        return w, b

    fc_w, fc_b = lin(ks[0], ks[1], IN_N, MID_N)
    mu_w, mu_b = lin(ks[2], ks[3], MID_N, HID_N)
    lv_w, lv_b = lin(ks[4], ks[5], MID_N, HID_N)
    dec_w, dec_b = lin(ks[6], ks[7], HID_N, MID_N)
    out_w, out_b = lin(ks[8], ks[9], MID_N, OUT_N)
    return dict(fc_w=fc_w, fc_b=fc_b, mu_w=mu_w, mu_b=mu_b,
                lv_w=lv_w, lv_b=lv_b, dec_w=dec_w, dec_b=dec_b,
                out_w=out_w, out_b=out_b)


def reference_forward(x, eps, p, mxu_dtype=jnp.float32):
    """Plain-JAX reference mirroring the PyTorch forward.

    With mxu_dtype=bf16 it also emulates the kernel's quantization (bf16 MXU
    operands, f32 accumulation/elementwise) for a tight numerical check.
    """
    def dense(a, w, b):
        return jnp.dot(a.astype(mxu_dtype), w.T.astype(mxu_dtype),
                       preferred_element_type=jnp.float32) + b

    z1 = jnp.maximum(dense(x, p["fc_w"], p["fc_b"]), 0.0)
    mu = dense(z1, p["mu_w"], p["mu_b"])
    logvar = dense(z1, p["lv_w"], p["lv_b"])
    z2 = eps * jnp.exp(0.5 * logvar) + mu
    h = jnp.maximum(dense(z2, p["dec_w"], p["dec_b"]), 0.0)
    out = 1.0 / (1.0 + jnp.exp(-dense(h, p["out_w"], p["out_b"])))
    return out, mu, logvar


if __name__ == "__main__":
    key = jax.random.PRNGKey(0)
    k_param, k_x, k_eps = jax.random.split(key, 3)

    params = init_params(k_param)
    # one-time packing/padding/bf16-cast of all weights (hoisted off the call path)
    w_pack, b_pack = prepare_params(params)
    w_pack, b_pack = jax.device_put(w_pack), jax.device_put(b_pack)

    x = jax.random.normal(k_x, (BATCH, IN_N), jnp.float32)
    # TODO(synk): torch.randn_like(std) noise is generated host-side (same stream as the
    # reference); in-kernel pltpu.prng_* would remove this input but change the RNG stream.
    eps = jax.random.normal(k_eps, (BATCH, HID_N), jnp.float32)

    out, mu, logvar = vae_forward(x, eps, w_pack, b_pack)
    jax.block_until_ready((out, mu, logvar))

    assert out.shape == (BATCH, OUT_N)
    assert mu.shape == (BATCH, HID_N) and logvar.shape == (BATCH, HID_N)

    # (1) tight check vs a reference that emulates the kernel's bf16 MXU operands
    q_out, q_mu, q_lv = reference_forward(x, eps, params, mxu_dtype=jnp.bfloat16)
    assert jnp.allclose(mu, q_mu, atol=1e-3), "mu mismatch (quantized ref)"
    assert jnp.allclose(logvar, q_lv, atol=1e-3), "logvar mismatch (quantized ref)"
    assert jnp.allclose(out, q_out, atol=2e-2), "out mismatch (quantized ref)"

    # (2) semantic check vs the full-f32 PyTorch-equivalent forward; the slack only
    # covers bf16 rounding of the MXU operands (weights are stored in bfloat16).
    r_out, r_mu, r_lv = reference_forward(x, eps, params)
    assert jnp.allclose(mu, r_mu, atol=5e-2), "mu mismatch (f32 ref)"
    assert jnp.allclose(logvar, r_lv, atol=5e-2), "logvar mismatch (f32 ref)"
    assert jnp.allclose(out, r_out, atol=5e-2), "out mismatch (f32 ref)"

    print("KERNEL_OK")
</pallas_src>

<mosaic_0001>
module attributes {stable_mosaic.version = 11 : i64} {
  func.func @_vae_kernel(%arg0: i32, %arg1: memref<8x128xf32, #tpu.memory_space<vmem>>, %arg2: memref<4x128x128xbf16, #tpu.memory_space<vmem>>, %arg3: memref<8x128xf32, #tpu.memory_space<vmem>>, %arg4: memref<8x128xf32, #tpu.memory_space<vmem>>) attributes {dimension_semantics = [#tpu.dimension_semantics<parallel>], iteration_bounds = array<i64: 1>, scalar_prefetch = 0 : i64, scratch_operands = 0 : i64, tpu.core_type = #tpu.core_type<tc>, window_params = [{transform_indices = @transform_0, window_bounds = array<i64: 8, 128>}, {pipeline_mode = #tpu.pipeline_mode<synchronous>, transform_indices = @transform_1, window_bounds = array<i64: 4, 128, 128>}, {pipeline_mode = #tpu.pipeline_mode<synchronous>, transform_indices = @transform_2, window_bounds = array<i64: 8, 128>}, {transform_indices = @transform_3, window_bounds = array<i64: 8, 128>}]} {
    %c0 = arith.constant 0 : index
    %c0_0 = arith.constant 0 : index
    %0 = vector.load %arg1[%c0, %c0_0] : memref<8x128xf32, #tpu.memory_space<vmem>>, vector<8x128xf32>
    %c0_1 = arith.constant 0 : index
    %c0_2 = arith.constant 0 : index
    %1 = vector.load %arg3[%c0_1, %c0_2] : memref<8x128xf32, #tpu.memory_space<vmem>>, vector<8x128xf32>
    %2 = tpu.iota {dimensions = array<i32: 1>} : vector<8x128xi32>
    %c4_i32 = arith.constant 4 : i32
    %3 = vector.broadcast %c4_i32 : i32 to vector<8x128xi32>
    %4 = arith.cmpi sge, %2, %3 : vector<8x128xi32>
    %c6_i32 = arith.constant 6 : i32
    %5 = vector.broadcast %c6_i32 : i32 to vector<8x128xi32>
    %6 = arith.cmpi slt, %2, %5 : vector<8x128xi32>
    %7 = arith.andi %4, %6 : vector<8x128xi1>
    %c6_i32_3 = arith.constant 6 : i32
    %8 = vector.broadcast %c6_i32_3 : i32 to vector<8x128xi32>
    %9 = arith.cmpi sge, %2, %8 : vector<8x128xi32>
    %c8_i32 = arith.constant 8 : i32
    %10 = vector.broadcast %c8_i32 : i32 to vector<8x128xi32>
    %11 = arith.cmpi slt, %2, %10 : vector<8x128xi32>
    %12 = arith.andi %9, %11 : vector<8x128xi1>
    %13 = arith.truncf %0 : vector<8x128xf32> to vector<8x128xbf16>
    %c0_4 = arith.constant 0 : index
    %c0_5 = arith.constant 0 : index
    %c0_6 = arith.constant 0 : index
    %14 = vector.load %arg2[%c0_4, %c0_5, %c0_6] : memref<4x128x128xbf16, #tpu.memory_space<vmem>>, vector<1x128x128xbf16>
    %15 = vector.shape_cast %14 : vector<1x128x128xbf16> to vector<128x128xbf16>
    %cst = arith.constant dense<0.000000e+00> : vector<8x128xf32>
    %16 = tpu.matmul %13, %15, %cst {dimension_numbers = #tpu.dot_dimension_numbers<[1], [0], [0], [1], [0, 0, 1, 1], [], []>} : vector<8x128xbf16>, vector<128x128xbf16>, vector<8x128xf32> -> vector<8x128xf32>
    %17 = vector.extract_strided_slice %1 {offsets = [0, 0], sizes = [1, 128], strides = [1, 1]} : vector<8x128xf32> to vector<1x128xf32>
    %18 = vector.broadcast %17 : vector<1x128xf32> to vector<8x128xf32>
    %19 = arith.addf %16, %18 : vector<8x128xf32>
    %cst_7 = arith.constant 0.000000e+00 : f32
    %20 = vector.broadcast %cst_7 : f32 to vector<8x128xf32>
    %21 = arith.maximumf %19, %20 : vector<8x128xf32>
    %22 = arith.truncf %21 : vector<8x128xf32> to vector<8x128xbf16>
    %c1 = arith.constant 1 : index
    %c0_8 = arith.constant 0 : index
    %c0_9 = arith.constant 0 : index
    %23 = vector.load %arg2[%c1, %c0_8, %c0_9] : memref<4x128x128xbf16, #tpu.memory_space<vmem>>, vector<1x128x128xbf16>
    %24 = vector.shape_cast %23 : vector<1x128x128xbf16> to vector<128x128xbf16>
    %cst_10 = arith.constant dense<0.000000e+00> : vector<8x128xf32>
    %25 = tpu.matmul %22, %24, %cst_10 {dimension_numbers = #tpu.dot_dimension_numbers<[1], [0], [0], [1], [0, 0, 1, 1], [], []>} : vector<8x128xbf16>, vector<128x128xbf16>, vector<8x128xf32> -> vector<8x128xf32>
    %26 = vector.extract_strided_slice %1 {offsets = [1, 0], sizes = [1, 128], strides = [1, 1]} : vector<8x128xf32> to vector<1x128xf32>
    %27 = vector.broadcast %26 : vector<1x128xf32> to vector<8x128xf32>
    %28 = arith.addf %25, %27 : vector<8x128xf32>
    %cst_11 = arith.constant 0.000000e+00 : f32
    %29 = vector.broadcast %cst_11 : f32 to vector<8x128xf32>
    %30 = arith.select %12, %28, %29 : vector<8x128xi1>, vector<8x128xf32>
    %cst_12 = arith.constant 5.000000e-01 : f32
    %31 = vector.broadcast %cst_12 : f32 to vector<8x128xf32>
    %32 = arith.mulf %31, %30 : vector<8x128xf32>
    %33 = math.exp %32 : vector<8x128xf32>
    %cst_13 = arith.constant 0.000000e+00 : f32
    %34 = vector.broadcast %cst_13 : f32 to vector<8x128xf32>
    %35 = arith.select %12, %0, %34 : vector<8x128xi1>, vector<8x128xf32>
    %cst_14 = arith.constant 0.000000e+00 : f32
    %36 = vector.broadcast %cst_14 : f32 to vector<8x128xf32>
    %37 = arith.select %7, %28, %36 : vector<8x128xi1>, vector<8x128xf32>
    %38 = arith.mulf %35, %33 : vector<8x128xf32>
    %39 = arith.addf %37, %38 : vector<8x128xf32>
    %40 = arith.truncf %39 : vector<8x128xf32> to vector<8x128xbf16>
    %c2 = arith.constant 2 : index
    %c0_15 = arith.constant 0 : index
    %c0_16 = arith.constant 0 : index
    %41 = vector.load %arg2[%c2, %c0_15, %c0_16] : memref<4x128x128xbf16, #tpu.memory_space<vmem>>, vector<1x128x128xbf16>
    %42 = vector.shape_cast %41 : vector<1x128x128xbf16> to vector<128x128xbf16>
    %cst_17 = arith.constant dense<0.000000e+00> : vector<8x128xf32>
    %43 = tpu.matmul %40, %42, %cst_17 {dimension_numbers = #tpu.dot_dimension_numbers<[1], [0], [0], [1], [0, 0, 1, 1], [], []>} : vector<8x128xbf16>, vector<128x128xbf16>, vector<8x128xf32> -> vector<8x128xf32>
    %44 = vector.extract_strided_slice %1 {offsets = [2, 0], sizes = [1, 128], strides = [1, 1]} : vector<8x128xf32> to vector<1x128xf32>
    %45 = vector.broadcast %44 : vector<1x128xf32> to vector<8x128xf32>
    %46 = arith.addf %43, %45 : vector<8x128xf32>
    %cst_18 = arith.constant 0.000000e+00 : f32
    %47 = vector.broadcast %cst_18 : f32 to vector<8x128xf32>
    %48 = arith.maximumf %46, %47 : vector<8x128xf32>
    %49 = arith.truncf %48 : vector<8x128xf32> to vector<8x128xbf16>
    %c3 = arith.constant 3 : index
    %c0_19 = arith.constant 0 : index
    %c0_20 = arith.constant 0 : index
    %50 = vector.load %arg2[%c3, %c0_19, %c0_20] : memref<4x128x128xbf16, #tpu.memory_space<vmem>>, vector<1x128x128xbf16>
    %51 = vector.shape_cast %50 : vector<1x128x128xbf16> to vector<128x128xbf16>
    %cst_21 = arith.constant dense<0.000000e+00> : vector<8x128xf32>
    %52 = tpu.matmul %49, %51, %cst_21 {dimension_numbers = #tpu.dot_dimension_numbers<[1], [0], [0], [1], [0, 0, 1, 1], [], []>} : vector<8x128xbf16>, vector<128x128xbf16>, vector<8x128xf32> -> vector<8x128xf32>
    %53 = vector.extract_strided_slice %1 {offsets = [3, 0], sizes = [1, 128], strides = [1, 1]} : vector<8x128xf32> to vector<1x128xf32>
    %54 = vector.broadcast %53 : vector<1x128xf32> to vector<8x128xf32>
    %55 = arith.addf %52, %54 : vector<8x128xf32>
    %cst_22 = arith.constant 0.000000e+00 : f32
    %56 = vector.broadcast %cst_22 : f32 to vector<8x128xf32>
    %57 = arith.subf %56, %55 : vector<8x128xf32>
    %58 = math.exp %57 : vector<8x128xf32>
    %cst_23 = arith.constant 1.000000e+00 : f32
    %59 = vector.broadcast %cst_23 : f32 to vector<8x128xf32>
    %60 = arith.addf %59, %58 : vector<8x128xf32>
    %cst_24 = arith.constant 1.000000e+00 : f32
    %61 = vector.broadcast %cst_24 : f32 to vector<8x128xf32>
    %62 = arith.divf %61, %60 : vector<8x128xf32>
    %c4_i32_25 = arith.constant 4 : i32
    %63 = vector.broadcast %c4_i32_25 : i32 to vector<8x128xi32>
    %64 = arith.cmpi slt, %2, %63 : vector<8x128xi32>
    %cst_26 = arith.constant 0.000000e+00 : f32
    %65 = vector.broadcast %cst_26 : f32 to vector<8x128xf32>
    %66 = arith.select %64, %62, %65 : vector<8x128xi1>, vector<8x128xf32>
    %67 = arith.addf %66, %28 : vector<8x128xf32>
    %c0_27 = arith.constant 0 : index
    %c0_28 = arith.constant 0 : index
    %68 = vector.load %arg4[%c0_27, %c0_28] : memref<8x128xf32, #tpu.memory_space<vmem>>, vector<8x128xf32>
    tpu.vector_store %arg4[%c0_27, %c0_28], %67 {strides = array<i32>} : memref<8x128xf32, #tpu.memory_space<vmem>>, vector<8x128xf32>,
    return
  }
  func.func @transform_0(%arg0: i32) -> (i32, i32) {
    %c0_i32 = arith.constant 0 : i32
    %c0_i32_0 = arith.constant 0 : i32
    return %arg0, %c0_i32 : i32, i32
  }
  func.func @transform_1(%arg0: i32) -> (i32, i32, i32) {
    %c0_i32 = arith.constant 0 : i32
    %c0_i32_0 = arith.constant 0 : i32
    %c0_i32_1 = arith.constant 0 : i32
    %c0_i32_2 = arith.constant 0 : i32
    return %c0_i32, %c0_i32_0, %c0_i32_1 : i32, i32, i32
  }
  func.func @transform_2(%arg0: i32) -> (i32, i32) {
    %c0_i32 = arith.constant 0 : i32
    %c0_i32_0 = arith.constant 0 : i32
    %c0_i32_1 = arith.constant 0 : i32
    return %c0_i32, %c0_i32_0 : i32, i32
  }
  func.func @transform_3(%arg0: i32) -> (i32, i32) {
    %c0_i32 = arith.constant 0 : i32
    %c0_i32_0 = arith.constant 0 : i32
    return %arg0, %c0_i32 : i32, i32
  }
}

</mosaic_0001>

<bundles_post_ra>
// kernel: vae_forward.1
= control target key start
LH: loop header
LB: loop body
LE: loop exit
PB: predicated region body
PF: predicated region fallthrough
CT: control target
= control target key end

     0   :  { %8 = vsyncpa [#allocation3], 0  ;;  %s716_s12 = smov [#allocation2]   ;;  %s810_s0 = inlined_call_operand.vmem [shape: f32[8,128], index: 0, kind: input, shape index: {}]   ;;  %s811_s1 = inlined_call_operand.hbm [shape: bf16[4,128,128], index: 1, kind: input, shape index: {}]   ;;  %s812_s2 = inlined_call_operand.vmem [shape: f32[8,128], index: 2, kind: input, shape index: {}]   ;;  %s813_s3 = inlined_call_operand.vmem [shape: f32[8,128], index: 3, kind: output, shape index: {}]  }
   0x1   :  { %s16_s13 = sshll.u32 %s716_s12, 4  ;;  %s17_s13 = int_to_ptr.vmem [resolvable:$true] %s16_s13 }
   0x2   :  { %s702_s14 = scalar_lea.vmem %s17_s13, 4096  ;;  %p707_p1 = scmp.lt.s32.totalorder %s17_s13, %s17_s13 }
   0x3   :  { %p703_p0 = scmp.ne.s32.totalorder %s17_s13, %s702_s14  ;;  %p708_p2 = scmp.lt.s32.totalorder %s702_s14, %s702_s14 }
   0x5   :  { %p709_p3 = por %p708_p2, %p707_p1 }
   0x7   :  { %p710_p4 = pnand %p709_p3, %p703_p0 }
   0x9   :  { %713 = shalt.err (!%p710_p4)
}
   0xa   :  { %s717_s15 = smov 64   ;;  %s718_s16 = smov 4  }
   0xb   :  { %22 = dma.hbm_to_vmem [thread:$0]  %s811_s1, 4096, %s17_s13, [#allocation3], %s717_s15, %s717_s15, %s718_s16  }
   0xc   :  { %714 = dma.done.wait [#allocation3], 4096  }
   0xd   :  { %715 = vsyncadd [#allocation3], 4294963200  ;;  %v719_v0 = vmov 0.0   ;;  %vm720_vm0 = vmmov 0   ;;  %v656_v1 = vld [vmem:[#allocation2 + $0x38] sm:$0xff]   ;;  %v657_v2 = vld [vmem:[#allocation2 + $0x30] sm:$0xff]   ;;  %v31_v20 = vlaneseq }
   0xe   :  { %571 = vmatprep.subr.bf16.mxu0 %v719_v0  ;;  %587 = vmatprep.mubr.msk.bf16.mxu0 %vm720_vm0, %v719_v0  ;;  %v658_v3 = vld [vmem:[#allocation2 + $0x28] sm:$0xff]   ;;  %v664_v4 = vld [vmem:[#allocation2 + $0x78] sm:$0xff]   ;;  %v659_v5 = vld [vmem:[#allocation2 + $0x20] sm:$0xff]  }
   0xf   :  { %591 = vmatprep.subr.bf16.mxu1 %v719_v0  ;;  %607 = vmatprep.mubr.msk.bf16.mxu1 %vm720_vm0, %v719_v0  ;;  %v665_v6 = vld [vmem:[#allocation2 + $0x70] sm:$0xff]   ;;  %v660_v7 = vld [vmem:[#allocation2 + $0x18] sm:$0xff]   ;;  %v666_v8 = vld [vmem:[#allocation2 + $0x68] sm:$0xff]   ;;  %v776_v21 = vshrl.u32 %v31_v20, 7  ;;  %v32_v45 = vand.u32 127, %v31_v20 }
  0x10   :  { %572 = vmatpush3.bf16.msra.mxu0 %v656_v1  ;;  %592 = vmatpush3.bf16.msra.mxu1 %v664_v4  ;;  %v661_v9 = vld [vmem:[#allocation2 + $0x10] sm:$0xff]   ;;  %v667_v10 = vld [vmem:[#allocation2 + $0x60] sm:$0xff]   ;;  %v662_v11 = vld [vmem:[#allocation2 + $0x8] sm:$0xff]  }
  0x11   :  { %573 = vmatprep.subr.bf16.mxu0 %v719_v0  ;;  %593 = vmatprep.subr.bf16.mxu1 %v719_v0  ;;  %v668_v12 = vld [vmem:[#allocation2 + $0x58] sm:$0xff]   ;;  %v663_v13 = vld [vmem:[#allocation2] sm:$0xff]   ;;  %v669_v15 = vld [vmem:[#allocation2 + $0x50] sm:$0xff]   ;;  %v58_v22 = vsub.s32 0, %v776_v21  ;;  %v169_v46 = vsub.s32 1, %v776_v21  ;;  %vm36_vm1 = vcmp.ge.s32.totalorder %v32_v45, 6 }
  0x12   :  { %v763_v14 = vld [vmem:[%s810_s0] sm:$0xff]  ;;  %v670_v17 = vld [vmem:[#allocation2 + $0x48] sm:$0xff]   ;;  %v672_v19 = vld [vmem:[#allocation2 + $0xb8] sm:$0xff]   ;;  %vm37_vm2 = vcmp.lt.s32.totalorder %v32_v45, 8  ;;  %vm33_vm4 = vcmp.ge.s32.totalorder %v32_v45, 4  ;;  %vm34_vm5 = vcmp.lt.s32.totalorder %v32_v45, 6 }
  0x13   :  { %v39_v16 = vpack.c.bf16 %v763_v14, %v763_v14  ;;  %v671_v18 = vld [vmem:[#allocation2 + $0x40] sm:$0xff]   ;;  %v673_v32 = vld [vmem:[#allocation2 + $0xb0] sm:$0xff]   ;;  %v674_v33 = vld [vmem:[#allocation2 + $0xa8] sm:$0xff]   ;;  %v287_v1 = vsub.s32 2, %v776_v21  ;;  %vm494_vm7 = vcmp.lt.s32.totalorder %v32_v45, 4 }
  0x14   :  { %574 = vmatpush3.bf16.msra.mxu0 %v657_v2  ;;  %594 = vmatpush3.bf16.msra.mxu1 %v665_v6  ;;  %v782_v23 = vld [vmem:[%s812_s2] sm:$0xff]  ;;  %v676_v35 = vld [vmem:[#allocation2 + $0x98] sm:$0xff]   ;;  %v677_v36 = vld [vmem:[#allocation2 + $0x90] sm:$0xff]  }
  0x15   :  { %575 = vmatprep.subr.bf16.mxu0 %v719_v0  ;;  %595 = vmatprep.subr.bf16.mxu1 %v719_v0  ;;  %v59_v24 = vrot.slane %v782_v23, %v58_v22  ;;  %v675_v34 = vld [vmem:[#allocation2 + $0xa0] sm:$0xff]   ;;  %v678_v37 = vld [vmem:[#allocation2 + $0x88] sm:$0xff]   ;;  %v680_v39 = vld [vmem:[#allocation2 + $0xf8] sm:$0xff]   ;;  %v170_v47 = vrot.slane %v782_v23, %v169_v46  ;;  %v288_v2 = vrot.slane %v782_v23, %v287_v1 }
  0x16   :  { %v679_v38 = vld [vmem:[#allocation2 + $0x80] sm:$0xff]   ;;  %v681_v40 = vld [vmem:[#allocation2 + $0xf0] sm:$0xff]   ;;  %v682_v41 = vld [vmem:[#allocation2 + $0xe8] sm:$0xff]  }
  0x17   :  { %v683_v42 = vld [vmem:[#allocation2 + $0xe0] sm:$0xff]   ;;  %v684_v43 = vld [vmem:[#allocation2 + $0xd8] sm:$0xff]   ;;  %v685_v44 = vld [vmem:[#allocation2 + $0xd0] sm:$0xff]  }
  0x18   :  { %576 = vmatpush3.bf16.msra.mxu0 %v658_v3  ;;  %596 = vmatpush3.bf16.msra.mxu1 %v666_v8  ;;  %vm38_vm3 = vmand %vm36_vm1, %vm37_vm2  ;;  %v686_v62 = vld [vmem:[#allocation2 + $0xc8] sm:$0xff]   ;;  %v687_v63 = vld [vmem:[#allocation2 + $0xc0] sm:$0xff]  }
  0x19   :  { %577 = vmatprep.subr.bf16.mxu0 %v719_v0  ;;  %597 = vmatprep.subr.bf16.mxu1 %v719_v0  ;;  %v263_v56 = vsel %vm38_vm3, %v763_v14, 0.0  ;;  %vm35_vm6 = vmand %vm33_vm4, %vm34_vm5 }
  0x1c   :  { %578 = vmatpush3.bf16.msra.mxu0 %v659_v5  ;;  %598 = vmatpush3.bf16.msra.mxu1 %v667_v10  ;;  %v398_v10 = vsub.s32 3, %v776_v21 }
  0x1d   :  { %579 = vmatprep.subr.bf16.mxu0 %v719_v0  ;;  %599 = vmatprep.subr.bf16.mxu1 %v719_v0 }
  0x20   :  { %580 = vmatpush3.bf16.msra.mxu0 %v660_v7  ;;  %600 = vmatpush3.bf16.msra.mxu1 %v668_v12 }
  0x21   :  { %581 = vmatprep.subr.bf16.mxu0 %v719_v0  ;;  %601 = vmatprep.subr.bf16.mxu1 %v719_v0 }
  0x24   :  { %582 = vmatpush3.bf16.msra.mxu0 %v661_v9  ;;  %602 = vmatpush3.bf16.msra.mxu1 %v669_v15 }
  0x25   :  { %583 = vmatprep.subr.bf16.mxu0 %v719_v0  ;;  %603 = vmatprep.subr.bf16.mxu1 %v719_v0 }
  0x28   :  { %584 = vmatpush3.bf16.msra.mxu0 %v662_v11  ;;  %604 = vmatpush3.bf16.msra.mxu1 %v670_v17  ;;  %v399_v11 = vrot.slane %v782_v23, %v398_v10 }
  0x29   :  { %585 = vmatprep.subr.bf16.mxu0 %v719_v0  ;;  %605 = vmatprep.subr.bf16.mxu1 %v719_v0 }
  0x2c   :  { %586 = vmatpush3.bf16.msra.mxu0 %v663_v13  ;;  %606 = vmatpush3.bf16.msra.mxu1 %v671_v18 }
  0x2d   :  { %611 = vmatprep.subr.bf16.mxu0 %v719_v0  ;;  %631 = vmatprep.subr.bf16.mxu1 %v719_v0 }
  0x2f   :  { %588 = vmatmul.mubr.bf16.vlgmr.msra.gmra.mxu0 %v39_v16 }
  0x30   :  { %627 = vmatprep.mubr.msk.bf16.mxu0 %vm720_vm0, %v719_v0  ;;  %612 = vmatpush3.bf16.msra.mxu0 %v672_v19 }
  0x31   :  { %613 = vmatprep.subr.bf16.mxu0 %v719_v0 }
  0x34   :  { %614 = vmatpush3.bf16.msra.mxu0 %v673_v32 }
  0x35   :  { %615 = vmatprep.subr.bf16.mxu0 %v719_v0 }
  0x38   :  { %616 = vmatpush3.bf16.msra.mxu0 %v674_v33 }
  0x39   :  { %617 = vmatprep.subr.bf16.mxu0 %v719_v0 }
  0x3c   :  { %618 = vmatpush3.bf16.msra.mxu0 %v675_v34 }
  0x3d   :  { %619 = vmatprep.subr.bf16.mxu0 %v719_v0 }
  0x40   :  { %620 = vmatpush3.bf16.msra.mxu0 %v676_v35 }
  0x41   :  { %621 = vmatprep.subr.bf16.mxu0 %v719_v0 }
  0x44   :  { %622 = vmatpush3.bf16.msra.mxu0 %v677_v36 }
  0x45   :  { %623 = vmatprep.subr.bf16.mxu0 %v719_v0 }
  0x48   :  { %624 = vmatpush3.bf16.msra.mxu0 %v678_v37 }
  0x49   :  { %625 = vmatprep.subr.bf16.mxu0 %v719_v0 }
  0x4c   :  { %626 = vmatpush3.bf16.msra.mxu0 %v679_v38 }
  0xef   :  { %v142_v25 = vpop.f32.mrf.mxu0 }
  0xf0   :  { %v143_v26 = vadd.f32 %v142_v25, %v59_v24 }
  0xf1   :  { %v589_v27 = vpop.f32.mrf.mxu0 }
  0xf2   :  { %v148_v28 = vmax.f32 %v143_v26, 0.0 }
  0xf3   :  { %v145_v29 = vpop.f32.mrf.mxu0 }
  0xf4   :  { %v149_v30 = vpack.c.bf16 %v148_v28, %v148_v28 }
  0xf5   :  { %v590_v31 = vpop.f32.mrf.mxu0 }
  0xf6   :  { %608 = vmatmul.mubr.bf16.vlgmr.msra.gmra.mxu1 %v149_v30 }
  0xf7   :  { %647 = vmatprep.mubr.msk.bf16.mxu1 %vm720_vm0, %v719_v0  ;;  %632 = vmatpush3.bf16.msra.mxu1 %v680_v39 }
  0xf8   :  { %633 = vmatprep.subr.bf16.mxu1 %v719_v0 }
  0xfb   :  { %634 = vmatpush3.bf16.msra.mxu1 %v681_v40 }
  0xfc   :  { %635 = vmatprep.subr.bf16.mxu1 %v719_v0 }
  0xff   :  { %636 = vmatpush3.bf16.msra.mxu1 %v682_v41 }
 0x100   :  { %637 = vmatprep.subr.bf16.mxu1 %v719_v0 }
 0x103   :  { %638 = vmatpush3.bf16.msra.mxu1 %v683_v42 }
 0x104   :  { %639 = vmatprep.subr.bf16.mxu1 %v719_v0 }
 0x107   :  { %640 = vmatpush3.bf16.msra.mxu1 %v684_v43 }
 0x108   :  { %641 = vmatprep.subr.bf16.mxu1 %v719_v0 }
 0x10b   :  { %642 = vmatpush3.bf16.msra.mxu1 %v685_v44 }
 0x10c   :  { %643 = vmatprep.subr.bf16.mxu1 %v719_v0 }
 0x10f   :  { %644 = vmatpush3.bf16.msra.mxu1 %v686_v62 }
 0x110   :  { %645 = vmatprep.subr.bf16.mxu1 %v719_v0 }
 0x113   :  { %646 = vmatpush3.bf16.msra.mxu1 %v687_v63 }
 0x1b6   :  { %v253_v48 = vpop.f32.mrf.mxu1 }
 0x1b7   :  { %v254_v49 = vadd.f32 %v253_v48, %v170_v47 }
 0x1b8   :  { %v609_v50 = vpop.f32.mrf.mxu1 }
 0x1b9   :  { %v259_v51 = vsel %vm38_vm3, %v254_v49, 0.0  ;;  %v264_v59 = vsel %vm35_vm6, %v254_v49, 0.0 }
 0x1ba   :  { %v260_v52 = vmul.f32 0.5, %v259_v51  ;;  %v256_v53 = vpop.f32.mrf.mxu1 }
 0x1bc   :  { %v261_v54 = vmul.f32 1.442695, %v260_v52  ;;  %v610_v55 = vpop.f32.mrf.mxu1 }
 0x1be   :  { %688 = vpow2.f32 %v261_v54 }
 0x1cb   :  { %v689_v57 = vpop.eup %688 }
 0x1cc   :  { %v265_v58 = vmul.f32 %v689_v57, %v263_v56 }
 0x1ce   :  { %v266_v60 = vadd.f32 %v265_v58, %v264_v59 }
 0x1d0   :  { %v267_v61 = vpack.c.bf16 %v266_v60, %v266_v60 }
 0x1d2   :  { %628 = vmatmul.mubr.bf16.vlgmr.msra.gmra.mxu0 %v267_v61 }
 0x292   :  { %v371_v3 = vpop.f32.mrf.mxu0 }
 0x293   :  { %v372_v4 = vadd.f32 %v371_v3, %v288_v2 }
 0x294   :  { %v629_v5 = vpop.f32.mrf.mxu0 }
 0x295   :  { %v377_v6 = vmax.f32 %v372_v4, 0.0 }
 0x296   :  { %v374_v7 = vpop.f32.mrf.mxu0 }
 0x297   :  { %v378_v8 = vpack.c.bf16 %v377_v6, %v377_v6 }
 0x298   :  { %v630_v9 = vpop.f32.mrf.mxu0 }
 0x299   :  { %648 = vmatmul.mubr.bf16.vlgmr.msra.gmra.mxu1 %v378_v8 }
 0x359   :  { %v482_v12 = vpop.f32.mrf.mxu1 }
 0x35a   :  { %v483_v0 = vadd.f32 %v482_v12, %v399_v11 }
 0x35b   :  { %v649_v13 = vpop.f32.mrf.mxu1 }
 0x35c   :  { %v488_v14 = vsub.f32 0.0, %v483_v0 }
 0x35d   :  { %v485_v15 = vpop.f32.mrf.mxu1 }
 0x35e   :  { %v489_v16 = vmul.f32 1.442695, %v488_v14 }
 0x35f   :  { %v650_v17 = vpop.f32.mrf.mxu1 }
 0x360   :  { %690 = vpow2.f32 %v489_v16 }
 0x36d   :  { %v691_v18 = vpop.eup %690 }
 0x36e   :  { %v491_v19 = vadd.f32 1.0, %v691_v18 }
 0x370   :  { %692 = vrcp.f32 %v491_v19 }
 0x37d   :  { %v693_v20 = vpop.eup %692 }
 0x37e   :  { %v495_v22 = vsel %vm494_vm7, %v693_v20, 0.0 }
 0x37f   :  { %v496_v24 = vadd.f32 %v495_v22, %v254_v49 }
 0x381   :  { %497 = vst [vmem:[%s813_s3] sm:$0xff] %v496_v24 }
 0x382   :  { %502 = vsyncpa [#allocation3], 1 }

</bundles_post_ra>
